<compile_context>
chip_gen: v7x
topology: tpu7x:2x2x1
jax: 0.10.0
libtpu: 0.0.40
codegen_flags: <defaults>
</compile_context>

<pallas_src>
import functools

import numpy as np
import jax
import jax.numpy as jnp
from jax.experimental import pallas as pl
from jax.experimental.pallas import tpu as pltpu

# Deterministic "config" (cfg.INPUT.* / cfg.MODEL.*) — synthetic, defined in-script.
LENGTH = 16.0        # cfg.INPUT.RECORD_LENGTH (or SPECTROGRAM.RESOLUTION[0])
THRESHOLD = 0.5      # cfg.MODEL.THRESHOLD
NUM_CLASSES = 3      # cfg.MODEL.NUM_CLASSES (not used by forward())

NUM_FIELDS = 6       # field rows: [start, end, class_dense, aux1, aux2, valid]
OUT_LANES = 128      # lane-dense output width
MAX_B_BLOCK = 128    # records per grid step (upper bound, multiple of 8)
F_START, F_END, F_CLASS, F_AUX1, F_AUX2, F_VALID = 0, 1, 2, 3, 4, 5


def _target_transform_kernel(slab_ref, out_ref, *, c_pad):
    # slab_ref: (NUM_FIELDS, B, N) — one field per leading index.
    start = slab_ref[F_START]                         # (B, N)
    end = slab_ref[F_END]                             # (B, N)
    cls = slab_ref[F_CLASS].astype(jnp.int32)         # (B, N) dense ids 0..C-1
    aux1 = slab_ref[F_AUX1]                           # (B, N)
    aux2 = slab_ref[F_AUX2]                           # (B, N)
    valid_f = slab_ref[F_VALID]                       # (B, N) 0/1

    b, n = start.shape

    # Validity folded into frac: padded lanes contribute nothing to any class.
    frac = (end - start) * jnp.float32(1.0 / LENGTH) * valid_f            # (B, N)

    # One-hot over dense class ids, laid out (B, C, N) so the causal prefix is
    # a single (B*C, N) @ (N, N) MXU matmul with no transposes.  c_pad is a
    # multiple of 8 so the (B, C) -> (B*C) merge is tile-aligned.
    c_iota = jax.lax.broadcasted_iota(jnp.int32, (b, c_pad, n), 1)
    onehot = jnp.where(cls[:, None, :] == c_iota,
                       jnp.float32(1.0), jnp.float32(0.0))                # (B, C, N)
    frac_oh = frac[:, None, :] * onehot                                   # (B, C, N)

    # tri_u[j, i] = 1 iff j <= i  (2-D causal mask, built once per step).
    jj = jax.lax.broadcasted_iota(jnp.int32, (n, n), 0)
    ii = jax.lax.broadcasted_iota(jnp.int32, (n, n), 1)
    tri_u = jnp.where(jj <= ii, jnp.float32(1.0), jnp.float32(0.0))       # (N, N)

    # prefix[b, c, i] = sum_{j <= i} frac_oh[b, c, j]   (MXU, full-f32 passes)
    prefix = jnp.dot(frac_oh.reshape(b * c_pad, n), tri_u,
                     preferred_element_type=jnp.float32,
                     precision=jax.lax.Precision.HIGHEST
                     ).reshape(b, c_pad, n)
    # cum[b, i] = running content of row i's own class right after row i.
    cum = jnp.sum(prefix * onehot, axis=1)                                # (B, N)

    # A row triggers when its class's running content exceeds THRESHOLD; the
    # last triggering row wins (Python loop order).  The valid gate keeps
    # padded lanes (which alias class 0 with frac=0) from ever winning.
    trig = (cum > jnp.float32(THRESHOLD)) & (valid_f > jnp.float32(0.5))  # (B, N)
    lane = jax.lax.broadcasted_iota(jnp.int32, (b, n), 1)
    last = jnp.max(jnp.where(trig, lane, -1), axis=1, keepdims=True)      # (B, 1)
    any_t = jnp.where(last >= 0, jnp.float32(1.0), jnp.float32(0.0))      # (B, 1)
    sel = jnp.where(lane == last, jnp.float32(1.0), jnp.float32(0.0))     # (B, N)
    out1 = jnp.sum(sel * aux1, axis=1, keepdims=True)                     # (B, 1)
    out2 = jnp.sum(sel * aux2, axis=1, keepdims=True)                     # (B, 1)

    # Lane-dense (B, 128) store: lanes 0..2 = [flag, aux1, aux2], rest 0.
    out_lane = jax.lax.broadcasted_iota(jnp.int32, out_ref.shape, 1)
    out_ref[...] = jnp.where(out_lane == 0, any_t,
                   jnp.where(out_lane == 1, out1,
                   jnp.where(out_lane == 2, out2, jnp.float32(0.0))))


def _pack_records(records, b_block=None):
    """Host-side packing into a per-grid-step-contiguous slab.

    Returns (slab, b_block, n_pad, c_pad) with
      slab: (n_blocks, NUM_FIELDS, b_block, n_pad) float32.
    """
    num = len(records)

    prepped = []
    max_n, max_c = 0, 1
    for rec in records:
        if rec is None or rec[0] is None:
            prepped.append(None)
            continue
        lines = np.asarray(rec[0], np.float32)        # (n, 2)
        labels = np.asarray(rec[1], np.float32)       # (n, 3)
        n = int(lines.shape[0])
        if n == 0:
            prepped.append(None)
            continue
        # Dense class remap — exact dict-key semantics for arbitrary label values.
        _, dense = np.unique(labels[:, 0], return_inverse=True)
        prepped.append((lines, labels, dense.astype(np.float32)))
        max_n = max(max_n, n)
        max_c = max(max_c, int(dense.max()) + 1)

    n_pad = max(128, ((max_n + 127) // 128) * 128)    # lane axis
    c_pad = max(8, ((max_c + 7) // 8) * 8)            # one-hot depth, tile-aligned

    if b_block is None:
        # Records per grid step: as large as possible (amortize ~0.35us/step),
        # capped so (B, C, N) f32 temps stay ~<=1 MiB each (fits v5e's 16 MiB
        # scoped-VMEM default and v7x's 64 MiB physical VMEM with headroom).
        budget = max(8, ((16384 // n_pad) // 8) * 8)
        b_block = min(MAX_B_BLOCK, budget, max(8, ((num + 7) // 8) * 8))
    else:
        b_block = max(8, ((int(b_block) + 7) // 8) * 8)
    n_blocks = max(1, -(-num // b_block))

    slab = np.zeros((n_blocks, NUM_FIELDS, b_block, n_pad), np.float32)
    for b, p in enumerate(prepped):
        if p is None:
            continue  # "lines is None" / empty -> all-invalid row -> zeros(3)
        lines, labels, dense = p
        n = lines.shape[0]
        blk, row = divmod(b, b_block)
        slab[blk, F_START, row, :n] = lines[:, 0]
        slab[blk, F_END, row, :n] = lines[:, 1]
        slab[blk, F_CLASS, row, :n] = dense
        slab[blk, F_AUX1, row, :n] = labels[:, 1]
        slab[blk, F_AUX2, row, :n] = labels[:, 2]
        slab[blk, F_VALID, row, :n] = 1.0
    return jnp.asarray(slab), b_block, n_pad, c_pad


def target_transform_batch(records, b_block=None):
    """Batched TargetTransform: records is a list of (lines, labels) or None.

    Returns a (len(records), 3) float32 array of [positive_flag, aux1, aux2].
    """
    num = len(records)
    if num == 0:
        return jnp.zeros((0, 3), jnp.float32)

    slab, b_block, n_pad, c_pad = _pack_records(records, b_block)
    n_blocks = slab.shape[0]

    kernel = functools.partial(_target_transform_kernel, c_pad=c_pad)
    out = pl.pallas_call(
        kernel,
        out_shape=jax.ShapeDtypeStruct((n_blocks * b_block, OUT_LANES),
                                       jnp.float32),
        grid=(n_blocks,),
        in_specs=[
            # One contiguous (NUM_FIELDS, b_block, n_pad) slab per grid step.
            pl.BlockSpec((pl.Squeezed(), NUM_FIELDS, b_block, n_pad),
                         lambda i: (i, 0, 0, 0)),
        ],
        out_specs=pl.BlockSpec((b_block, OUT_LANES), lambda i: (i, 0)),
        compiler_params=pltpu.CompilerParams(
            dimension_semantics=("parallel",)),
    )(slab)
    return out[:num, :3]


def target_transform(lines=None, labels=None):
    """Single-record convenience wrapper mirroring TargetTransform.forward."""
    if lines is None:
        return jnp.zeros((3,), jnp.float32)
    return target_transform_batch([(lines, labels)])[0]


def _reference(lines, labels):
    """Pure-Python reference of the forward loop (dict keyed by class value)."""
    out = np.zeros(3, np.float32)
    contents = {}
    for idx in range(lines.shape[0]):
        c = float(labels[idx, 0])
        contents[c] = contents.get(c, 0.0) + float(lines[idx, 1] - lines[idx, 0]) / LENGTH
        if contents[c] > THRESHOLD:
            out[0] = 1.0
            out[1] = labels[idx, 1]
            out[2] = labels[idx, 2]
    return out


if __name__ == "__main__":
    key = jax.random.PRNGKey(0)

    def make_record(n, key):
        k1, k2, k3, k4 = jax.random.split(key, 4)
        start = jax.random.uniform(k1, (n,), jnp.float32, 0.0, LENGTH * 0.5)
        span = jax.random.uniform(k2, (n,), jnp.float32, 1.0, LENGTH * 0.6)
        lines = jnp.stack([start, start + span], axis=1)                 # (n, 2)
        cls = jax.random.randint(k3, (n,), 0, NUM_CLASSES).astype(jnp.float32)
        aux = jax.random.uniform(k4, (n, 2), jnp.float32, 0.0, 5.0)
        labels = jnp.concatenate([cls[:, None], aux], axis=1)            # (n, 3)
        return lines, labels

    # Batch with varying record lengths plus a None record ("lines is None").
    records = []
    for n in (6, 5, 8, 7):
        key, sub = jax.random.split(key)
        records.append(make_record(n, sub))
    records.append(None)

    out = jax.block_until_ready(target_transform_batch(records))
    assert out.shape == (len(records), 3) and out.dtype == jnp.float32

    for b, rec in enumerate(records):
        ref = (np.zeros(3, np.float32) if rec is None
               else _reference(np.asarray(rec[0]), np.asarray(rec[1])))
        assert np.allclose(np.asarray(out[b]), ref, atol=1e-5), (b, out[b], ref)

    # Larger batch with a forced small block to exercise multiple grid steps
    # (multi-block Squeezed indexing, megacore-parallel grid axis).
    records2 = []
    for i in range(20):
        key, sub = jax.random.split(key)
        records2.append(make_record(4 + (i % 5), sub))
    out2 = jax.block_until_ready(target_transform_batch(records2, b_block=8))
    for b, rec in enumerate(records2):
        ref = _reference(np.asarray(rec[0]), np.asarray(rec[1]))
        assert np.allclose(np.asarray(out2[b]), ref, atol=1e-5), (b, out2[b], ref)

    # Single-record wrapper and the None branch.
    single = jax.block_until_ready(target_transform(records[0][0], records[0][1]))
    ref0 = _reference(np.asarray(records[0][0]), np.asarray(records[0][1]))
    assert np.allclose(np.asarray(single), ref0, atol=1e-5), (single, ref0)

    out_none = jax.block_until_ready(target_transform(None, None))
    assert np.allclose(np.asarray(out_none), np.zeros(3))

    print("KERNEL_OK")
</pallas_src>

<mosaic_0001>
module attributes {stable_mosaic.version = 11 : i64} {
  func.func @_target_transform_kernel(%arg0: i32, %arg1: memref<1x6x8x128xf32, #tpu.memory_space<vmem>>, %arg2: memref<8x128xf32, #tpu.memory_space<vmem>>) attributes {dimension_semantics = [#tpu.dimension_semantics<parallel>], iteration_bounds = array<i64: 1>, scalar_prefetch = 0 : i64, scratch_operands = 0 : i64, tpu.core_type = #tpu.core_type<tc>, window_params = [{transform_indices = @transform_0, window_bounds = array<i64: 1, 6, 8, 128>}, {transform_indices = @transform_1, window_bounds = array<i64: 8, 128>}]} {
    %c0 = arith.constant 0 : index
    %c0_0 = arith.constant 0 : index
    %c0_1 = arith.constant 0 : index
    %c0_2 = arith.constant 0 : index
    %0 = vector.load %arg1[%c0, %c0_0, %c0_1, %c0_2] : memref<1x6x8x128xf32, #tpu.memory_space<vmem>>, vector<1x1x8x128xf32>
    %1 = vector.shape_cast %0 : vector<1x1x8x128xf32> to vector<8x128xf32>
    %c0_3 = arith.constant 0 : index
    %c1 = arith.constant 1 : index
    %c0_4 = arith.constant 0 : index
    %c0_5 = arith.constant 0 : index
    %2 = vector.load %arg1[%c0_3, %c1, %c0_4, %c0_5] : memref<1x6x8x128xf32, #tpu.memory_space<vmem>>, vector<1x1x8x128xf32>
    %3 = vector.shape_cast %2 : vector<1x1x8x128xf32> to vector<8x128xf32>
    %c0_6 = arith.constant 0 : index
    %c2 = arith.constant 2 : index
    %c0_7 = arith.constant 0 : index
    %c0_8 = arith.constant 0 : index
    %4 = vector.load %arg1[%c0_6, %c2, %c0_7, %c0_8] : memref<1x6x8x128xf32, #tpu.memory_space<vmem>>, vector<1x1x8x128xf32>
    %5 = vector.shape_cast %4 : vector<1x1x8x128xf32> to vector<8x128xf32>
    %6 = arith.fptosi %5 : vector<8x128xf32> to vector<8x128xi32>
    %c0_9 = arith.constant 0 : index
    %c3 = arith.constant 3 : index
    %c0_10 = arith.constant 0 : index
    %c0_11 = arith.constant 0 : index
    %7 = vector.load %arg1[%c0_9, %c3, %c0_10, %c0_11] : memref<1x6x8x128xf32, #tpu.memory_space<vmem>>, vector<1x1x8x128xf32>
    %8 = vector.shape_cast %7 : vector<1x1x8x128xf32> to vector<8x128xf32>
    %c0_12 = arith.constant 0 : index
    %c4 = arith.constant 4 : index
    %c0_13 = arith.constant 0 : index
    %c0_14 = arith.constant 0 : index
    %9 = vector.load %arg1[%c0_12, %c4, %c0_13, %c0_14] : memref<1x6x8x128xf32, #tpu.memory_space<vmem>>, vector<1x1x8x128xf32>
    %10 = vector.shape_cast %9 : vector<1x1x8x128xf32> to vector<8x128xf32>
    %c0_15 = arith.constant 0 : index
    %c5 = arith.constant 5 : index
    %c0_16 = arith.constant 0 : index
    %c0_17 = arith.constant 0 : index
    %11 = vector.load %arg1[%c0_15, %c5, %c0_16, %c0_17] : memref<1x6x8x128xf32, #tpu.memory_space<vmem>>, vector<1x1x8x128xf32>
    %12 = vector.shape_cast %11 : vector<1x1x8x128xf32> to vector<8x128xf32>
    %13 = arith.subf %3, %1 : vector<8x128xf32>
    %cst = arith.constant 6.250000e-02 : f32
    %14 = vector.broadcast %cst : f32 to vector<8x128xf32>
    %15 = arith.mulf %13, %14 : vector<8x128xf32>
    %16 = arith.mulf %15, %12 : vector<8x128xf32>
    %17 = tpu.iota {dimensions = array<i32: 1>} : vector<8x8x128xi32>
    %18 = vector.shape_cast %6 : vector<8x128xi32> to vector<8x1x128xi32>
    %19 = vector.broadcast %18 : vector<8x1x128xi32> to vector<8x8x128xi32>
    %20 = arith.cmpi eq, %19, %17 : vector<8x8x128xi32>
    %cst_18 = arith.constant 1.000000e+00 : f32
    %cst_19 = arith.constant 0.000000e+00 : f32
    %21 = vector.broadcast %cst_18 : f32 to vector<8x8x128xf32>
    %22 = vector.broadcast %cst_19 : f32 to vector<8x8x128xf32>
    %23 = arith.select %20, %21, %22 : vector<8x8x128xi1>, vector<8x8x128xf32>
    %24 = vector.shape_cast %16 : vector<8x128xf32> to vector<8x1x128xf32>
    %25 = vector.broadcast %24 : vector<8x1x128xf32> to vector<8x8x128xf32>
    %26 = arith.mulf %25, %23 : vector<8x8x128xf32>
    %27 = tpu.iota {dimensions = array<i32: 0>} : vector<128x128xi32>
    %28 = tpu.iota {dimensions = array<i32: 1>} : vector<128x128xi32>
    %29 = arith.cmpi sle, %27, %28 : vector<128x128xi32>
    %cst_20 = arith.constant 1.000000e+00 : f32
    %cst_21 = arith.constant 0.000000e+00 : f32
    %30 = vector.broadcast %cst_20 : f32 to vector<128x128xf32>
    %31 = vector.broadcast %cst_21 : f32 to vector<128x128xf32>
    %32 = arith.select %29, %30, %31 : vector<128x128xi1>, vector<128x128xf32>
    %33 = vector.shape_cast %26 : vector<8x8x128xf32> to vector<64x128xf32>
    %cst_22 = arith.constant dense<0.000000e+00> : vector<64x128xf32>
    %34 = tpu.matmul %33, %32, %cst_22 {dimension_numbers = #tpu.dot_dimension_numbers<[1], [0], [0], [1], [0, 0, 1, 1], [], []>, precision = #tpu.contract_precision<fp32>} : vector<64x128xf32>, vector<128x128xf32>, vector<64x128xf32> -> vector<64x128xf32>
    %35 = vector.shape_cast %34 : vector<64x128xf32> to vector<8x8x128xf32>
    %36 = arith.mulf %35, %23 : vector<8x8x128xf32>
    %cst_23 = arith.constant dense<0.000000e+00> : vector<8x128xf32>
    %37 = vector.multi_reduction <add>, %36, %cst_23 [1] : vector<8x8x128xf32> to vector<8x128xf32>
    %cst_24 = arith.constant 5.000000e-01 : f32
    %38 = vector.broadcast %cst_24 : f32 to vector<8x128xf32>
    %39 = arith.cmpf ogt, %37, %38 : vector<8x128xf32>
    %cst_25 = arith.constant 5.000000e-01 : f32
    %40 = vector.broadcast %cst_25 : f32 to vector<8x128xf32>
    %41 = arith.cmpf ogt, %12, %40 : vector<8x128xf32>
    %42 = arith.andi %39, %41 : vector<8x128xi1>
    %43 = tpu.iota {dimensions = array<i32: 1>} : vector<8x128xi32>
    %c-1_i32 = arith.constant -1 : i32
    %44 = vector.broadcast %c-1_i32 : i32 to vector<8x128xi32>
    %45 = arith.select %42, %43, %44 : vector<8x128xi1>, vector<8x128xi32>
    %cst_26 = arith.constant dense<-2147483648> : vector<8xi32>
    %46 = vector.multi_reduction <maxsi>, %45, %cst_26 [1] : vector<8x128xi32> to vector<8xi32>
    %47 = vector.shape_cast %46 : vector<8xi32> to vector<8x1xi32>
    %c0_i32 = arith.constant 0 : i32
    %48 = vector.broadcast %c0_i32 : i32 to vector<8x1xi32>
    %49 = arith.cmpi sge, %47, %48 : vector<8x1xi32>
    %cst_27 = arith.constant 1.000000e+00 : f32
    %cst_28 = arith.constant 0.000000e+00 : f32
    %50 = vector.broadcast %cst_27 : f32 to vector<8x1xf32>
    %51 = vector.broadcast %cst_28 : f32 to vector<8x1xf32>
    %52 = arith.select %49, %50, %51 : vector<8x1xi1>, vector<8x1xf32>
    %53 = vector.broadcast %47 : vector<8x1xi32> to vector<8x128xi32>
    %54 = arith.cmpi eq, %43, %53 : vector<8x128xi32>
    %cst_29 = arith.constant 1.000000e+00 : f32
    %cst_30 = arith.constant 0.000000e+00 : f32
    %55 = vector.broadcast %cst_29 : f32 to vector<8x128xf32>
    %56 = vector.broadcast %cst_30 : f32 to vector<8x128xf32>
    %57 = arith.select %54, %55, %56 : vector<8x128xi1>, vector<8x128xf32>
    %58 = arith.mulf %57, %8 : vector<8x128xf32>
    %cst_31 = arith.constant dense<0.000000e+00> : vector<8xf32>
    %59 = vector.multi_reduction <add>, %58, %cst_31 [1] : vector<8x128xf32> to vector<8xf32>
    %60 = vector.shape_cast %59 : vector<8xf32> to vector<8x1xf32>
    %61 = arith.mulf %57, %10 : vector<8x128xf32>
    %cst_32 = arith.constant dense<0.000000e+00> : vector<8xf32>
    %62 = vector.multi_reduction <add>, %61, %cst_32 [1] : vector<8x128xf32> to vector<8xf32>
    %63 = vector.shape_cast %62 : vector<8xf32> to vector<8x1xf32>
    %64 = tpu.iota {dimensions = array<i32: 1>} : vector<8x128xi32>
    %c0_i32_33 = arith.constant 0 : i32
    %65 = vector.broadcast %c0_i32_33 : i32 to vector<8x128xi32>
    %66 = arith.cmpi eq, %64, %65 : vector<8x128xi32>
    %c1_i32 = arith.constant 1 : i32
    %67 = vector.broadcast %c1_i32 : i32 to vector<8x128xi32>
    %68 = arith.cmpi eq, %64, %67 : vector<8x128xi32>
    %c2_i32 = arith.constant 2 : i32
    %69 = vector.broadcast %c2_i32 : i32 to vector<8x128xi32>
    %70 = arith.cmpi eq, %64, %69 : vector<8x128xi32>
    %cst_34 = arith.constant 0.000000e+00 : f32
    %71 = vector.shape_cast %63 : vector<8x1xf32> to vector<8x1xf32>
    %72 = vector.broadcast %71 : vector<8x1xf32> to vector<8x128xf32>
    %73 = vector.broadcast %cst_34 : f32 to vector<8x128xf32>
    %74 = arith.select %70, %72, %73 : vector<8x128xi1>, vector<8x128xf32>
    %75 = vector.shape_cast %60 : vector<8x1xf32> to vector<8x1xf32>
    %76 = vector.broadcast %75 : vector<8x1xf32> to vector<8x128xf32>
    %77 = arith.select %68, %76, %74 : vector<8x128xi1>, vector<8x128xf32>
    %78 = vector.shape_cast %52 : vector<8x1xf32> to vector<8x1xf32>
    %79 = vector.broadcast %78 : vector<8x1xf32> to vector<8x128xf32>
    %80 = arith.select %66, %79, %77 : vector<8x128xi1>, vector<8x128xf32>
    %c0_35 = arith.constant 0 : index
    %c0_36 = arith.constant 0 : index
    %81 = vector.load %arg2[%c0_35, %c0_36] : memref<8x128xf32, #tpu.memory_space<vmem>>, vector<8x128xf32>
    tpu.vector_store %arg2[%c0_35, %c0_36], %80 {strides = array<i32>} : memref<8x128xf32, #tpu.memory_space<vmem>>, vector<8x128xf32>,
    return
  }
  func.func @transform_0(%arg0: i32) -> (i32, i32, i32, i32) {
    %c0_i32 = arith.constant 0 : i32
    %c0_i32_0 = arith.constant 0 : i32
    %c0_i32_1 = arith.constant 0 : i32
    %c0_i32_2 = arith.constant 0 : i32
    return %arg0, %c0_i32, %c0_i32_0, %c0_i32_1 : i32, i32, i32, i32
  }
  func.func @transform_1(%arg0: i32) -> (i32, i32) {
    %c0_i32 = arith.constant 0 : i32
    %c0_i32_0 = arith.constant 0 : i32
    return %arg0, %c0_i32 : i32, i32
  }
}

</mosaic_0001>

<bundles_post_ra>
// kernel: tpu_custom_call.1
= control target key start
LH: loop header
LB: loop body
LE: loop exit
PB: predicated region body
PF: predicated region fallthrough
CT: control target
= control target key end

     0   :  { %6 = vsyncpa [#allocation3], 0  ;;  %s2781_s0 = inlined_call_operand.hbm [shape: f32[1,6,8,128], index: 0, kind: input, shape index: {}]   ;;  %s2782_s1 = inlined_call_operand.hbm [shape: f32[8,128], index: 1, kind: output, shape index: {}]  }
   0x1   :  { %7 = vsyncpa [#allocation4], 0  ;;  %s2040_s6 = smov [#allocation2]   ;;  %s1992_s10 = scalar_lea.hbm %s2781_s0, 768 }
   0x2   :  { %s13_s7 = sshll.u32 %s2040_s6, 4  ;;  %p1993_p0 = scmp.ne.s32.totalorder %s2781_s0, %s1992_s10  ;;  %s14_s7 = int_to_ptr.vmem [resolvable:$true] %s13_s7 }
   0x3   :  { %p1996_p1 = scmp.lt.u32.totalorder %s1992_s10, %s2781_s0 }
   0x5   :  { %p1998_p2 = pnand %p1996_p1, %p1993_p0 }
   0x7   :  { %2001 = shalt.err (!%p1998_p2)
}
   0x8   :  { %s2002_s15 = scalar_lea.vmem %s14_s7, 768  ;;  %p2007_p4 = scmp.lt.s32.totalorder %s14_s7, %s14_s7 }
   0x9   :  { %p2003_p3 = scmp.ne.s32.totalorder %s14_s7, %s2002_s15  ;;  %p2008_p5 = scmp.lt.s32.totalorder %s2002_s15, %s2002_s15 }
   0xb   :  { %p2009_p6 = por %p2008_p5, %p2007_p4 }
   0xd   :  { %p2010_p7 = pnand %p2009_p6, %p2003_p3 }
   0xf   :  { %2013 = shalt.err (!%p2010_p7)
}
  0x10   :  { %s2041_s16 = smov 128   ;;  %s2042_s17 = smov 8  }
  0x11   :  { %19 = dma.hbm_to_vmem [thread:$0]  %s2781_s0, 768, %s14_s7, [#allocation3], %s2041_s16, %s2041_s16, %s2042_s17  }
  0x12   :  { %2036 = dma.done.wait [#allocation3], 768  }
  0x13   :  { %2037 = vsyncadd [#allocation3], 4294966528  ;;  %v38_v0 = vlaneseq  ;;  %v2783_v6 = vmov 0.0   ;;  %v2785_v14 = vmov 1.0|1.0   ;;  %v27_v34 = vld [vmem:[#allocation2 + $0x10] sm:$0xff] }
  0x14   :  { %v2045_v35 = vmov 1966171168   ;;  %v23_v40 = vld [vmem:[#allocation2] sm:$0xff]  ;;  %v25_v41 = vld [vmem:[#allocation2 + $0x8] sm:$0xff]  ;;  %v1982_v49 = vtrunc.f32 %v27_v34  ;;  %s2047_s0 = smov [#allocation5]  }
  0x15   :  { %v2070_v1 = vshrl.u32 %v38_v0, 7  ;;  %v2072_v2 = vand.u32 127, %v38_v0  ;;  %v42_v36 = vunpack.c.l.s4 %v2045_v35  ;;  %v35_v50 = vsub.f32 %v25_v41, %v23_v40  ;;  %v2248_v59 = vld [vmem:[#allocation2 + $0x28] sm:$0xff]  ;;  %s1285_s20 = sshll.u32 %s2047_s0, 4  ;;  %s1286_s20 = int_to_ptr.vmem [resolvable:$true] %s1285_s20 }
  0x16   :  { %2812 = vst [vmem:[#allocation9_spill] sm:$0xff] %v2248_v59  ;;  %v2254_v62 = vcvt.f32.s32 %v1982_v49  ;;  %s2014_s21 = scalar_lea.vmem %s1286_s20, 128  ;;  %p2019_p9 = scmp.lt.s32.totalorder %s1286_s20, %s1286_s20 }
  0x17   :  { %2801 = vst [vmem:[#allocation8_spill] sm:$0xff] %v2072_v2  ;;  %v235_v3 = vadd.s32 8, %v2070_v1  ;;  %vm252_vm0 = vcmp.le.s32.totalorder %v2070_v1, %v2072_v2  ;;  %v236_v4 = vadd.s32 16, %v2070_v1  ;;  %v237_v5 = vadd.s32 24, %v2070_v1  ;;  %p2015_p8 = scmp.ne.s32.totalorder %s1286_s20, %s2014_s21  ;;  %p2020_p10 = scmp.lt.s32.totalorder %s2014_s21, %s2014_s21 }
  0x18   :  { %v268_v7 = vsel %vm252_vm0, 1.0, %v2783_v6  ;;  %v238_v8 = vadd.s32 32, %v2070_v1  ;;  %v239_v9 = vadd.s32 40, %v2070_v1  ;;  %v240_v10 = vadd.s32 48, %v2070_v1 }
  0x19   :  { %vm253_vm1 = vcmp.le.s32.totalorder %v235_v3, %v2072_v2  ;;  %vm254_vm2 = vcmp.le.s32.totalorder %v236_v4, %v2072_v2  ;;  %vm255_vm3 = vcmp.le.s32.totalorder %v237_v5, %v2072_v2  ;;  %v2091_v13 = vsub.f32 %v268_v7, %v268_v7  ;;  %p2021_p11 = por %p2020_p10, %p2019_p9 }
  0x1a   :  { %v269_v11 = vsel %vm253_vm1, 1.0, %v2783_v6  ;;  %vm2087_vm4 = vmpackc.low %vm253_vm1, %vm252_vm0  ;;  %v270_v16 = vsel %vm254_vm2, 1.0, %v2783_v6  ;;  %v271_v17 = vsel %vm255_vm3, 1.0, %v2783_v6  ;;  %vm256_vm6 = vcmp.le.s32.totalorder %v238_v8, %v2072_v2 }
  0x1b   :  { %1751 = vmatprep.subr.msk.bf16.mxu1 %vm2087_vm4, %v2785_v14  ;;  %v2096_v15 = vsub.f32 %v269_v11, %v269_v11  ;;  %1847 = vmatprep.subr.msk.bf16.mxu0 %vm2087_vm4, %v2785_v14  ;;  %vm2103_vm5 = vmpackc.low %vm255_vm3, %vm254_vm2  ;;  %vm257_vm7 = vcmp.le.s32.totalorder %v239_v9, %v2072_v2  ;;  %v272_v19 = vsel %vm256_vm6, 1.0, %v2783_v6  ;;  %v241_v20 = vadd.s32 56, %v2070_v1  ;;  %p2022_p12 = pnand %p2021_p11, %p2015_p8 }
  0x1c   :  { %1753 = vmatpush3.bf16.msk.msra.mxu1 %vm2087_vm4, %v2785_v14  ;;  %1849 = vmatpush3.bf16.msk.msra.mxu0 %vm2087_vm4, %v2785_v14  ;;  %vm258_vm8 = vcmp.le.s32.totalorder %v240_v10, %v2072_v2  ;;  %v273_v21 = vsel %vm257_vm7, 1.0, %v2783_v6  ;;  %v242_v23 = vadd.s32 64, %v2070_v1  ;;  %v243_v24 = vadd.s32 72, %v2070_v1  ;;  %vm2138_vm9 = vmpackc.low %vm257_vm7, %vm256_vm6 }
  0x1d   :  { %1755 = vmatprep.subr.msk.bf16.mxu1 %vm2103_vm5, %v2785_v14  ;;  %1851 = vmatprep.subr.msk.bf16.mxu0 %vm2103_vm5, %v2785_v14  ;;  %v274_v22 = vsel %vm258_vm8, 1.0, %v2783_v6  ;;  %v2132_v25 = vsub.f32 %v270_v16, %v270_v16  ;;  %v2134_v26 = vsub.f32 %v271_v17, %v271_v17  ;;  %vm259_vm10 = vcmp.le.s32.totalorder %v241_v20, %v2072_v2  ;;  %v2833_v42 = vld [vmem:[#allocation9_spill] sm:$0xff] }
  0x1e   :  { %v2144_v28 = vadd.s32 80, %v2070_v1  ;;  %v2146_v29 = vsub.f32 %v272_v19, %v272_v19  ;;  %v2148_v30 = vsub.f32 %v273_v21, %v273_v21  ;;  %v275_v31 = vsel %vm259_vm10, 1.0, %v2783_v6  ;;  %vm2184_vm14 = vmpackc.low %vm259_vm10, %vm258_vm8 }
  0x1f   :  { %v245_v32 = vadd.s32 88, %v2070_v1  ;;  %v2160_v33 = vsub.f32 %v274_v22, %v274_v22  ;;  %vm260_vm11 = vcmp.le.s32.totalorder %v242_v23, %v2072_v2  ;;  %vm261_vm12 = vcmp.le.s32.totalorder %v243_v24, %v2072_v2 }
  0x20   :  { %1757 = vmatpush3.bf16.msk.msra.mxu1 %vm2103_vm5, %v2785_v14  ;;  %1853 = vmatpush3.bf16.msk.msra.mxu0 %vm2103_vm5, %v2785_v14  ;;  %v2170_v37 = vsub.f32 %v275_v31, %v275_v31  ;;  %v276_v38 = vsel %vm260_vm11, 1.0, %v2783_v6  ;;  %v277_v39 = vsel %vm261_vm12, 1.0, %v2783_v6  ;;  %vm262_vm13 = vcmp.le.s32.totalorder %v2144_v28, %v2072_v2  ;;  %vm2232_vm6 = vmpackc.low %vm261_vm12, %vm260_vm11 }
  0x21   :  { %1759 = vmatprep.subr.msk.bf16.mxu1 %vm2138_vm9, %v2785_v14  ;;  %1855 = vmatprep.subr.msk.bf16.mxu0 %vm2138_vm9, %v2785_v14  ;;  %vm263_vm15 = vcmp.le.s32.totalorder %v245_v32, %v2072_v2  ;;  %v278_v43 = vsel %vm262_vm13, 1.0, %v2783_v6  ;;  %v246_v44 = vadd.s32 96, %v2070_v1  ;;  %v247_v45 = vadd.s32 104, %v2070_v1 }
  0x22   :  { %v279_v46 = vsel %vm263_vm15, 1.0, %v2783_v6  ;;  %v2199_v47 = vadd.s32 112, %v2070_v1  ;;  %v2202_v48 = vadd.s32 120, %v2070_v1  ;;  %v43_v51 = vunpack.c.0.s8 %v42_v36  ;;  %vm2289_vm7 = vmpackc.low %vm263_vm15, %vm262_vm13 }
  0x23   :  { %vm264_vm0 = vcmp.le.s32.totalorder %v246_v44, %v2072_v2  ;;  %vm265_vm1 = vcmp.le.s32.totalorder %v247_v45, %v2072_v2  ;;  %v2236_v55 = vsub.f32 %v276_v38, %v276_v38  ;;  %v2238_v56 = vsub.f32 %v277_v39, %v277_v39 }
  0x24   :  { %1761 = vmatpush3.bf16.msk.msra.mxu1 %vm2138_vm9, %v2785_v14  ;;  %1857 = vmatpush3.bf16.msk.msra.mxu0 %vm2138_vm9, %v2785_v14  ;;  %v280_v52 = vsel %vm264_vm0, 1.0, %v2783_v6  ;;  %v281_v53 = vsel %vm265_vm1, 1.0, %v2783_v6  ;;  %vm266_vm2 = vcmp.le.s32.totalorder %v2199_v47, %v2072_v2  ;;  %vm267_vm3 = vcmp.le.s32.totalorder %v2202_v48, %v2072_v2  ;;  %vm2331_vm8 = vmpackc.low %vm265_vm1, %vm264_vm0 }
  0x25   :  { %1763 = vmatprep.subr.msk.bf16.mxu1 %vm2184_vm14, %v2785_v14  ;;  %1859 = vmatprep.subr.msk.bf16.mxu0 %vm2184_vm14, %v2785_v14  ;;  %v282_v57 = vsel %vm266_vm2, 1.0, %v2783_v6  ;;  %v283_v58 = vsel %vm267_vm3, 1.0, %v2783_v6  ;;  %v2250_v60 = vsub.f32 %v278_v43, %v278_v43  ;;  %v2252_v61 = vsub.f32 %v279_v46, %v279_v46  ;;  %vm2378_vm11 = vmpackc.low %vm267_vm3, %vm266_vm2 }
  0x26   :  { %v36_v63 = vmul.f32 0.0625, %v35_v50  ;;  %v2262_v0 = vsub.f32 %v280_v52, %v280_v52  ;;  %v2264_v3 = vsub.f32 %v281_v53, %v281_v53  ;;  %v2267_v4 = vsub.s32 %v43_v51, %v2070_v1 }
  0x27   :  { %v431_v5 = vand.u32 4294901760, %v2091_v13  ;;  %v2276_v7 = vsub.f32 %v282_v57, %v282_v57  ;;  %v2278_v8 = vsub.f32 %v283_v58, %v283_v58  ;;  %v437_v10 = vand.u32 4294901760, %v2096_v15 }
  0x28   :  { %1765 = vmatpush3.bf16.msk.msra.mxu1 %vm2184_vm14, %v2785_v14  ;;  %1861 = vmatpush3.bf16.msk.msra.mxu0 %vm2184_vm14, %v2785_v14  ;;  %v2281_v9 = vmul.f32 %v36_v63, %v2248_v59  ;;  %v47_v16 = vrot.slane %v2254_v62, %v2267_v4  ;;  %v2296_v17 = vsub.s32 0, %v2070_v1  ;;  %v443_v20 = vand.u32 4294901760, %v2132_v25 }
  0x29   :  { %1767 = vmatprep.subr.msk.bf16.mxu1 %vm2232_vm6, %v2785_v14  ;;  %1863 = vmatprep.subr.msk.bf16.mxu0 %vm2232_vm6, %v2785_v14  ;;  %v432_v19 = vsub.f32 %v2091_v13, %v431_v5  ;;  %v438_v23 = vsub.f32 %v2096_v15, %v437_v10  ;;  %v449_v24 = vand.u32 4294901760, %v2134_v26  ;;  %v2325_v36 = vpack.c.bf16 %v437_v10, %v431_v5 }
  0x2a   :  { %v145_v22 = vrot.slane %v2281_v9, %v2267_v4  ;;  %v55_v28 = vcombine.high %v47_v16, %v47_v16  ;;  %v2313_v31 = vrot.slane %v47_v16, %v2267_v4  ;;  %v444_v32 = vsub.f32 %v2132_v25, %v443_v20 }
  0x2b   :  { %v433_v40 = vand.u32 4294901760, %v432_v19  ;;  %v439_v41 = vand.u32 4294901760, %v438_v23  ;;  %v450_v49 = vsub.f32 %v2134_v26, %v449_v24  ;;  %v455_v58 = vand.u32 4294901760, %v2146_v29 }
  0x2c   :  { %1769 = vmatpush3.bf16.msk.msra.mxu1 %vm2232_vm6, %v2785_v14  ;;  %1865 = vmatpush3.bf16.msk.msra.mxu0 %vm2232_vm6, %v2785_v14  ;;  %v153_v34 = vcombine.high %v145_v22, %v145_v22  ;;  %v2323_v35 = vrot.slane %v145_v22, %v2267_v4  ;;  %v92_v39 = vrot.slane %v2313_v31, %v2296_v17  ;;  %v445_v52 = vand.u32 4294901760, %v444_v32 }
  0x2d   :  { %1771 = vmatprep.subr.msk.bf16.mxu1 %vm2289_vm7, %v2785_v14  ;;  %1867 = vmatprep.subr.msk.bf16.mxu0 %vm2289_vm7, %v2785_v14  ;;  %v2338_v43 = vrot.slane %v55_v28, %v2267_v4  ;;  %v85_v46 = vcombine.high %v2313_v31, %v2313_v31  ;;  %v461_v63 = vand.u32 4294901760, %v2148_v30  ;;  %v2818_v5 = vmov 0 }
  0x2e   :  { %v190_v44 = vrot.slane %v2323_v35, %v2296_v17  ;;  %v2345_v45 = vrot.slane %v153_v34, %v2267_v4  ;;  %vm121_vm10 = vcmp.eq.s32.totalorder %v92_v39, %v2070_v1  ;;  %v183_v50 = vcombine.high %v2323_v35, %v2323_v35 }
  0x2f   :  { %v96_v51 = vrot.slane %v2338_v43, %v2296_v17  ;;  %v2366_v53 = vsel %vm121_vm10, 1.0, %v2783_v6  ;;  %v2819_v5 = vsel %vm2378_vm11, 4294967295, %v2818_v5  ;;  %v2383_v16 = vpack.c.bf16 %v439_v41, %v433_v40 }
  0x30   :  { %1773 = vmatpush3.bf16.msk.msra.mxu1 %vm2289_vm7, %v2785_v14  ;;  %1869 = vmatpush3.bf16.msk.msra.mxu0 %vm2289_vm7, %v2785_v14  ;;  %2817 = vst [vmem:[#allocation10_spill] sm:$0xff] %v2366_v53  ;;  %v194_v57 = vrot.slane %v2345_v45, %v2296_v17  ;;  %2820 = vst [vmem:[#allocation11_spill] sm:$0xff] %v2819_v5  ;;  %v227_v10 = vmul.f32 %v190_v44, %v2366_v53  ;;  %v467_v19 = vand.u32 4294901760, %v2160_v33  ;;  %vm1231_vm10 = vcmask 1042434  }
  0x31   :  { %1775 = vmatprep.subr.msk.bf16.mxu1 %vm2331_vm8, %v2785_v14  ;;  %1871 = vmatprep.subr.msk.bf16.mxu0 %vm2331_vm8, %v2785_v14  ;;  %vm122_vm12 = vcmp.eq.s32.totalorder %v96_v51, %v2070_v1  ;;  %v451_v23 = vand.u32 4294901760, %v450_v49  ;;  %v456_v47 = vsub.f32 %v2146_v29, %v455_v58  ;;  %v462_v48 = vsub.f32 %v2148_v30, %v461_v63 }
  0x32   :  { %v2388_v22 = vsel %vm122_vm12, 1.0, %v2783_v6  ;;  %v2398_v28 = vand.u32 4294901760, %v227_v10  ;;  %v2402_v32 = vsub.f32 %v2160_v33, %v467_v19  ;;  %v473_v34 = vand.u32 4294901760, %v2170_v37 }
  0x33   :  { %2821 = vst [vmem:[#allocation12_spill] sm:$0xff] %v2388_v22  ;;  %v228_v31 = vmul.f32 %v194_v57, %v2388_v22  ;;  %v457_v35 = vand.u32 4294901760, %v456_v47  ;;  %v463_v39 = vand.u32 4294901760, %v462_v48  ;;  %v479_v40 = vand.u32 4294901760, %v2236_v55 }
  0x34   :  { %1777 = vmatpush3.bf16.msk.msra.mxu1 %vm2331_vm8, %v2785_v14  ;;  %1873 = vmatpush3.bf16.msk.msra.mxu0 %vm2331_vm8, %v2785_v14  ;;  %v485_v41 = vand.u32 4294901760, %v2238_v56  ;;  %v138_v44 = vcombine.high %v2281_v9, %v2281_v9  ;;  %v2416_v49 = vsub.f32 %v227_v10, %v2398_v28  ;;  %v474_v57 = vsub.f32 %v2170_v37, %v473_v34 }
  0x35   :  { %1779 = vmatprep.subr.msk.bf16.mxu1 %vm2378_vm11, %v2785_v14  ;;  %1875 = vmatprep.subr.msk.bf16.mxu0 %vm2378_vm11, %v2785_v14  ;;  %v2418_v51 = vand.u32 4294901760, %v228_v31  ;;  %v2421_v21 = vpack.c.bf16 %v451_v23, %v445_v52  ;;  %v1882_v6 = vpack.c.bf16 %v449_v24, %v443_v20  ;;  %v2423_v14 = vpack.c.bf16 %v461_v63, %v455_v58 }
  0x36   :  { %v480_v47 = vsub.f32 %v2236_v55, %v479_v40  ;;  %v2822_v48 = vmov 1.0|1.0   ;;  %v351_v9 = vand.u32 4294901760, %v2416_v49  ;;  %v2436_v52 = vpack.c.bf16 %v463_v39, %v457_v35 }
  0x37   :  { %v2434_v10 = vsub.f32 %v228_v31, %v2418_v51  ;;  %v2438_v20 = vpack.c.bf16 %v473_v34, %v467_v19  ;;  %v469_v24 = vand.u32 4294901760, %v2402_v32  ;;  %v486_v58 = vsub.f32 %v2238_v56, %v485_v41  ;;  %v2835_v38 = vld [vmem:[#allocation10_spill] sm:$0xff] }
  0x38   :  { %1781 = vmatpush3.bf16.msk.msra.mxu1 %vm2378_vm11, %v2822_v48  ;;  %1877 = vmatpush3.bf16.msk.msra.mxu0 %vm2378_vm11, %v2822_v48  ;;  %v100_v63 = vrot.slane %v85_v46, %v2296_v17  ;;  %v198_v23 = vrot.slane %v183_v50, %v2296_v17  ;;  %v352_v2 = vsub.f32 %v2416_v49, %v351_v9  ;;  %v475_v35 = vand.u32 4294901760, %v474_v57 }
  0x39   :  { %2823 = vst [vmem:[#allocation13_spill] sm:$0xff] %v2434_v10  ;;  %1783 = vmatprep.subr.bf16.mxu1 %v2383_v16  ;;  %1879 = vmatprep.subr.bf16.mxu0 %v2325_v36  ;;  %v361_v31 = vand.u32 4294901760, %v2434_v10  ;;  %v491_v19 = vand.u32 4294901760, %v2250_v60  ;;  %v481_v34 = vand.u32 4294901760, %v480_v47  ;;  %v497_v39 = vand.u32 4294901760, %v2252_v61 }
  0x3a   :  { %1650 = vmatprep.mubr.f32.mxu0 %v351_v9  ;;  %vm123_vm13 = vcmp.eq.s32.totalorder %v100_v63, %v2070_v1  ;;  %v87_v32 = vcombine.high %v2338_v43, %v2338_v43  ;;  %v353_v53 = vand.u32 4294901760, %v352_v2  ;;  %v2824_v50 = vmov 0.0  }
  0x3b   :  { %v362_v46 = vsub.f32 %v2434_v10, %v361_v31  ;;  %1651 = vmatmul.mubr.f32.vlgmr.msra.gmra.mrb[0].mxu0 %v361_v31  ;;  %v2455_v22 = vsel %vm123_vm13, 1.0, %v2824_v50  ;;  %v492_v9 = vsub.f32 %v2250_v60, %v491_v19  ;;  %v487_v57 = vand.u32 4294901760, %v486_v58 }
  0x3c   :  { %2825 = vst [vmem:[#allocation14_spill] sm:$0xff] %v2455_v22  ;;  %1881 = vmatpush3.bf16.msra.mxu0 %v2325_v36  ;;  %v229_v47 = vmul.f32 %v198_v23, %v2455_v22  ;;  %v498_v63 = vsub.f32 %v2252_v61, %v497_v39  ;;  %v104_v59 = vrot.slane %v87_v32, %v2296_v17 }
  0x3d   :  { %1518 = vmatprep.mubr.f32.mxu1 %v353_v53  ;;  %v363_v43 = vand.u32 4294901760, %v362_v46  ;;  %1883 = vmatprep.subr.bf16.mxu0 %v1882_v6  ;;  %v493_v2 = vand.u32 4294901760, %v492_v9  ;;  %v185_v31 = vcombine.high %v2345_v45, %v2345_v45  ;;  %v2826_v10 = vcombine.high %v2254_v62, %v2254_v62 }
  0x3e   :  { %v2468_v36 = vand.u32 4294901760, %v229_v47  ;;  %v499_v58 = vand.u32 4294901760, %v498_v63  ;;  %vm124_vm15 = vcmp.eq.s32.totalorder %v104_v59, %v2070_v1  ;;  %v152_v23 = vrot.slane %v138_v44, %v2267_v4 }
  0x3f   :  { %v54_v5 = vrot.slane %v2826_v10, %v2267_v4  ;;  %1519 = vmatmul.mubr.f32.vlgmr.msra.gmra.mrb[0].mxu1 %v363_v43  ;;  %v2472_v53 = vpack.c.bf16 %v485_v41, %v479_v40  ;;  %v2475_v32 = vsel %vm124_vm15, 1.0, %v2824_v50  ;;  %v202_v45 = vrot.slane %v185_v31, %v2296_v17 }
  0x40   :  { %1785 = vmatpush3.bf16.msra.mxu1 %v2383_v16  ;;  %1885 = vmatpush3.bf16.msra.mxu0 %v1882_v6  ;;  %v1794_v62 = vpack.c.bf16 %v475_v35, %v469_v24  ;;  %v2481_v10 = vsub.f32 %v229_v47, %v2468_v36  ;;  %v168_v59 = vrot.slane %v152_v23, %v2267_v4  ;;  %v2796_v44 = vand.u32 4294901760, %v2262_v0 }
  0x41   :  { %v70_v46 = vrot.slane %v54_v5, %v2267_v4  ;;  %1787 = vmatprep.subr.bf16.mxu1 %v2421_v21  ;;  %1887 = vmatprep.subr.bf16.mxu0 %v2423_v14  ;;  %v2487_v40 = vpack.c.bf16 %v487_v57, %v481_v34  ;;  %v230_v41 = vmul.f32 %v202_v45, %v2475_v32  ;;  %v509_v63 = vand.u32 4294901760, %v2264_v3 }
  0x42   :  { %v371_v6 = vand.u32 4294901760, %v2481_v10  ;;  %v2492_v16 = vpack.c.bf16 %v499_v58, %v493_v2  ;;  %v2494_v24 = vpack.c.bf16 %v497_v39, %v491_v19  ;;  %v206_v35 = vrot.slane %v168_v59, %v2296_v17 }
  0x43   :  { %v108_v9 = vrot.slane %v70_v46, %v2296_v17  ;;  %v2497_v47 = vand.u32 4294901760, %v230_v41  ;;  %v56_v34 = vcombine.high %v54_v5, %v54_v5  ;;  %v504_v19 = vsub.f32 %v2262_v0, %v2796_v44 }
  0x44   :  { %1789 = vmatpush3.bf16.msra.mxu1 %v2421_v21  ;;  %1889 = vmatpush3.bf16.msra.mxu0 %v2423_v14  ;;  %v372_v57 = vsub.f32 %v2481_v10, %v371_v6  ;;  %v154_v39 = vcombine.high %v152_v23, %v152_v23  ;;  %v86_v58 = vcombine.high %v70_v46, %v70_v46  ;;  %v515_v45 = vand.u32 4294901760, %v2276_v7 }
  0x45   :  { %vm125_vm0 = vcmp.eq.s32.totalorder %v108_v9, %v2070_v1  ;;  %1791 = vmatprep.subr.bf16.mxu1 %v2436_v52  ;;  %1891 = vmatprep.subr.bf16.mxu0 %v2438_v20  ;;  %v2513_v5 = vsub.f32 %v230_v41, %v2497_v47  ;;  %v84_v14 = vrot.slane %v56_v34, %v2267_v4  ;;  %v521_v46 = vand.u32 4294901760, %v2278_v8 }
  0x46   :  { %v2505_v43 = vsel %vm125_vm0, 1.0, %v2824_v50  ;;  %v373_v2 = vand.u32 4294901760, %v372_v57  ;;  %1653 = vmatprep.mubr.f32.mxu0 %v371_v6  ;;  %v182_v31 = vrot.slane %v154_v39, %v2267_v4  ;;  %v184_v22 = vcombine.high %v168_v59, %v168_v59 }
  0x47   :  { %2827 = vst [vmem:[#allocation15_spill] sm:$0xff] %v2505_v43  ;;  %v231_v21 = vmul.f32 %v206_v35, %v2505_v43  ;;  %v381_v23 = vand.u32 4294901760, %v2513_v5  ;;  %v112_v44 = vrot.slane %v84_v14, %v2296_v17  ;;  %v510_v41 = vsub.f32 %v2264_v3, %v509_v63 }
  0x48   :  { %1793 = vmatpush3.bf16.msra.mxu1 %v2436_v52  ;;  %1893 = vmatpush3.bf16.msra.mxu0 %v2438_v20  ;;  %v210_v6 = vrot.slane %v182_v31, %v2296_v17  ;;  %v116_v4 = vrot.slane %v86_v58, %v2296_v17  ;;  %v505_v52 = vand.u32 4294901760, %v504_v19  ;;  %v214_v59 = vrot.slane %v184_v22, %v2296_v17 }
  0x49   :  { %v2520_v9 = vand.u32 4294901760, %v231_v21  ;;  %1795 = vmatprep.subr.bf16.mxu1 %v1794_v62  ;;  %1895 = vmatprep.subr.bf16.mxu0 %v2472_v53  ;;  %v382_v35 = vsub.f32 %v2513_v5, %v381_v23  ;;  %vm126_vm1 = vcmp.eq.s32.totalorder %v112_v44, %v2070_v1  ;;  %v511_v44 = vand.u32 4294901760, %v510_v41 }
  0x4a   :  { %1521 = vmatprep.mubr.f32.mxu1 %v373_v2  ;;  %1654 = vmatmul.mubr.f32.gmra.mrb[2].mxu0 %v381_v23  ;;  %v2536_v20 = vsel %vm126_vm1, 1.0, %v2824_v50  ;;  %vm127_vm2 = vcmp.eq.s32.totalorder %v116_v4, %v2070_v1  ;;  %v516_v2 = vsub.f32 %v2276_v7, %v515_v45  ;;  %v522_v23 = vsub.f32 %v2278_v8, %v521_v46 }
  0x4b   :  { %v2532_v34 = vsub.f32 %v231_v21, %v2520_v9  ;;  %2828 = vst [vmem:[#allocation16_spill] sm:$0xff] %v2536_v20  ;;  %v383_v57 = vand.u32 4294901760, %v382_v35  ;;  %v232_v58 = vmul.f32 %v210_v6, %v2536_v20  ;;  %v2543_v21 = vsel %vm127_vm2, 1.0, %v2824_v50 }
  0x4c   :  { %2829 = vst [vmem:[#allocation17_spill] sm:$0xff] %v2543_v21  ;;  %1797 = vmatpush3.bf16.msra.mxu1 %v1794_v62  ;;  %1897 = vmatpush3.bf16.msra.mxu0 %v2472_v53  ;;  %v233_v19 = vmul.f32 %v214_v59, %v2543_v21  ;;  %v88_v4 = vcombine.high %v84_v14, %v84_v14  ;;  %v2830_v53 = vand.u32 4294901760, %v2262_v0 }
  0x4d   :  { %v391_v39 = vand.u32 4294901760, %v2532_v34  ;;  %1799 = vmatprep.subr.bf16.mxu1 %v2487_v40  ;;  %1899 = vmatprep.subr.bf16.mxu0 %v2494_v24  ;;  %v2552_v6 = vand.u32 4294901760, %v232_v58  ;;  %v186_v35 = vcombine.high %v182_v31, %v182_v31  ;;  %v1806_v14 = vpack.c.bf16 %v511_v44, %v505_v52 }
  0x4e   :  { %1522 = vmatmul.mubr.f32.gmra.mrb[2].mxu1 %v383_v57  ;;  %v1902_v62 = vpack.c.bf16 %v509_v63, %v2830_v53  ;;  %v2556_v41 = vand.u32 4294901760, %v233_v19  ;;  %v120_v43 = vrot.slane %v88_v4, %v2296_v17  ;;  %v517_v57 = vand.u32 4294901760, %v516_v2 }
  0x4f   :  { %v392_v22 = vsub.f32 %v2532_v34, %v391_v39  ;;  %1656 = vmatprep.mubr.f32.mxu0 %v391_v39  ;;  %v2559_v21 = vsub.f32 %v232_v58, %v2552_v6  ;;  %v218_v20 = vrot.slane %v186_v35, %v2296_v17  ;;  %v523_v39 = vand.u32 4294901760, %v522_v23  ;;  %v2836_v35 = vld [vmem:[#allocation14_spill] sm:$0xff] }
  0x50   :  { %1801 = vmatpush3.bf16.msra.mxu1 %v2487_v40  ;;  %1901 = vmatpush3.bf16.msra.mxu0 %v2494_v24  ;;  %v2566_v31 = vsub.f32 %v233_v19, %v2556_v41  ;;  %vm128_vm3 = vcmp.eq.s32.totalorder %v120_v43, %v2070_v1  ;;  %v1906_v58 = vpack.c.bf16 %v521_v46, %v515_v45 }
  0x51   :  { %v393_v59 = vand.u32 4294901760, %v392_v22  ;;  %1803 = vmatprep.subr.bf16.mxu1 %v2492_v16  ;;  %v401_v63 = vand.u32 4294901760, %v2559_v21  ;;  %1903 = vmatprep.subr.bf16.mxu0 %v1902_v62  ;;  %v2573_v40 = vsel %vm128_vm3, 1.0, %v2824_v50  ;;  %v1810_v1 = vpack.c.bf16 %v523_v39, %v517_v57 }
  0x52   :  { %v411_v17 = vand.u32 4294901760, %v2566_v31  ;;  %v234_v52 = vmul.f32 %v218_v20, %v2573_v40  ;;  %v1814_v20 = vpack.c.bf16 %v2096_v15, %v2091_v13  ;;  %v1818_v13 = vpack.c.bf16 %v2134_v26, %v2132_v25 }
  0x53   :  { %1524 = vmatprep.mubr.f32.mxu1 %v393_v59  ;;  %v402_v24 = vsub.f32 %v2559_v21, %v401_v63  ;;  %1657 = vmatmul.mubr.f32.gmra.mrb[4].mxu0 %v401_v63  ;;  %v1822_v12 = vpack.c.bf16 %v2148_v30, %v2146_v29  ;;  %v1826_v15 = vpack.c.bf16 %v2170_v37, %v2160_v33  ;;  %v2832_v30 = vld [vmem:[#allocation13_spill] sm:$0xff] }
  0x54   :  { %1805 = vmatpush3.bf16.msra.mxu1 %v2492_v16  ;;  %1905 = vmatpush3.bf16.msra.mxu0 %v1902_v62  ;;  %v412_v44 = vsub.f32 %v2566_v31, %v411_v17  ;;  %v2579_v43 = vand.u32 4294901760, %v234_v52  ;;  %v1830_v18 = vpack.c.bf16 %v2238_v56, %v2236_v55  ;;  %v1834_v25 = vpack.c.bf16 %v2252_v61, %v2250_v60 }
  0x55   :  { %1807 = vmatprep.subr.bf16.mxu1 %v1806_v14  ;;  %v403_v19 = vand.u32 4294901760, %v402_v24  ;;  %1659 = vmatprep.mubr.f32.mxu0 %v411_v17  ;;  %v1838_v26 = vpack.c.bf16 %v2264_v3, %v2262_v0  ;;  %v1842_v27 = vpack.c.bf16 %v2278_v8, %v2276_v7  ;;  %v2046_v3 = vmov 0   ;;  %v2834_v8 = vld [vmem:[#allocation12_spill] sm:$0xff] }
  0x56   :  { %v413_v45 = vand.u32 4294901760, %v412_v44  ;;  %1907 = vmatprep.subr.bf16.mxu0 %v1906_v58  ;;  %v2582_v46 = vsub.f32 %v234_v52, %v2579_v43 }
  0x57   :  { %1525 = vmatmul.mubr.f32.gmra.mrb[4].mxu1 %v403_v19 }
  0x58   :  { %1809 = vmatpush3.bf16.msra.mxu1 %v1806_v14  ;;  %1527 = vmatprep.mubr.f32.mxu1 %v413_v45  ;;  %v421_v16 = vand.u32 4294901760, %v2582_v46 }
  0x59   :  { %1811 = vmatprep.subr.bf16.mxu1 %v1810_v1  ;;  %1909 = vmatpush3.bf16.msra.mxu0 %v1906_v58 }
  0x5a   :  { %1911 = vmatprep.subr.msk.bf16.mxu0 %vm2087_vm4, %v2822_v48  ;;  %v422_v2 = vsub.f32 %v2582_v46, %v421_v16  ;;  %1660 = vmatmul.mubr.f32.gmra.mrb[6].mxu0 %v421_v16 }
  0x5b   :  { %1694 = vmatprep.mubr.f32.mxu0 %v2398_v28 }
  0x5c   :  { %1813 = vmatpush3.bf16.msra.mxu1 %v1810_v1  ;;  %v423_v23 = vand.u32 4294901760, %v422_v2  ;;  %v2841_v1 = vld [vmem:[#allocation16_spill] sm:$0xff]  ;;  %v2844_v2 = vld [vmem:[#allocation15_spill] sm:$0xff] }
  0x5d   :  { %1815 = vmatprep.subr.bf16.mxu1 %v1814_v20 }
  0x5e   :  { %1528 = vmatmul.mubr.f32.gmra.mrb[6].mxu1 %v423_v23  ;;  %1695 = vmatmul.mubr.f32.vlgmr.msra.gmra.mrb[0].mxu0 %v2418_v51 }
  0x5f   :  { %1562 = vmatprep.mubr.f32.mxu1 %v2398_v28  ;;  %1913 = vmatpush3.bf16.msk.msra.mxu0 %vm2087_vm4, %v2822_v48  ;;  %vm1194_vm4 = vcmp.gt.f32.partialorder %v2833_v42, 0.5 }
  0x60   :  { %1915 = vmatprep.subr.msk.bf16.mxu0 %vm2103_vm5, %v2822_v48  ;;  %1697 = vmatprep.mubr.f32.mxu0 %v2468_v36  ;;  %v2685_v7 = vsel %vm1194_vm4, 1, %v2046_v3 }
  0x61   :  { %v1197_v62 = vrot.slane %v2685_v7, 2  ;;  %v1200_v45 = vrot.slane %v2685_v7, 5 }
  0x62   :  { %1563 = vmatmul.mubr.f32.vlgmr.msra.gmra.mrb[0].mxu1 %v2418_v51  ;;  %1698 = vmatmul.mubr.f32.gmra.mrb[2].mxu0 %v2497_v47 }
  0x63   :  { %1817 = vmatpush3.bf16.msra.mxu1 %v1814_v20  ;;  %1917 = vmatpush3.bf16.msk.msra.mxu0 %vm2103_vm5, %v2822_v48 }
  0x64   :  { %1819 = vmatprep.subr.bf16.mxu1 %v1818_v13  ;;  %1919 = vmatprep.subr.msk.bf16.mxu0 %vm2138_vm9, %v2822_v48 }
  0x65   :  { %1565 = vmatprep.mubr.f32.mxu1 %v2468_v36  ;;  %1700 = vmatprep.mubr.f32.mxu0 %v2520_v9 }
  0x66   :  { %1566 = vmatmul.mubr.f32.gmra.mrb[2].mxu1 %v2497_v47  ;;  %1701 = vmatmul.mubr.f32.gmra.mrb[4].mxu0 %v2552_v6 }
  0x67   :  { %1821 = vmatpush3.bf16.msra.mxu1 %v1818_v13  ;;  %1921 = vmatpush3.bf16.msk.msra.mxu0 %vm2138_vm9, %v2822_v48  ;;  %vm1228_vm9 = vcmask 1041409   ;;  %v1199_v13 = vrot.slane %v2685_v7, 4 }
  0x68   :  { %1823 = vmatprep.subr.bf16.mxu1 %v1822_v12  ;;  %1923 = vmatprep.subr.msk.bf16.mxu0 %vm2184_vm14, %v2822_v48 }
  0x69   :  { %1568 = vmatprep.mubr.f32.mxu1 %v2520_v9  ;;  %1703 = vmatprep.mubr.f32.mxu0 %v2556_v41 }
  0x6a   :  { %1569 = vmatmul.mubr.f32.gmra.mrb[4].mxu1 %v2552_v6  ;;  %1704 = vmatmul.mubr.f32.gmra.mrb[6].mxu0 %v2579_v43 }
  0x6b   :  { %1825 = vmatpush3.bf16.msra.mxu1 %v1822_v12  ;;  %1925 = vmatpush3.bf16.msk.msra.mxu0 %vm2184_vm14, %v2822_v48 }
  0x6c   :  { %1827 = vmatprep.subr.bf16.mxu1 %v1826_v15  ;;  %1927 = vmatprep.subr.msk.bf16.mxu0 %vm2232_vm6, %v2822_v48 }
  0x6d   :  { %1571 = vmatprep.mubr.f32.mxu1 %v2556_v41  ;;  %1738 = vmatprep.mubr.f32.mxu0 %v2398_v28 }
  0x6e   :  { %1572 = vmatmul.mubr.f32.gmra.mrb[6].mxu1 %v2579_v43 }
  0x6f   :  { %1829 = vmatpush3.bf16.msra.mxu1 %v1826_v15  ;;  %1929 = vmatpush3.bf16.msk.msra.mxu0 %vm2232_vm6, %v2822_v48  ;;  %vm2704_vm6 = vcmp.ne.s32.totalorder %v1197_v62, 0 }
  0x70   :  { %1831 = vmatprep.subr.bf16.mxu1 %v1830_v18  ;;  %1931 = vmatprep.subr.msk.bf16.mxu0 %vm2289_vm7, %v2822_v48 }
  0x71   :  { %1606 = vmatprep.mubr.f32.mxu1 %v2416_v49 }
  0x73   :  { %1833 = vmatpush3.bf16.msra.mxu1 %v1830_v18  ;;  %1933 = vmatpush3.bf16.msk.msra.mxu0 %vm2289_vm7, %v2822_v48  ;;  %vm2710_vm7 = vcmp.ne.s32.totalorder %v1200_v45, 0 }
  0x74   :  { %1835 = vmatprep.subr.bf16.mxu1 %v1834_v25  ;;  %1935 = vmatprep.subr.msk.bf16.mxu0 %vm2331_vm8, %v2822_v48 }
  0x77   :  { %1837 = vmatpush3.bf16.msra.mxu1 %v1834_v25  ;;  %1937 = vmatpush3.bf16.msk.msra.mxu0 %vm2331_vm8, %v2822_v48  ;;  %vm2715_vm8 = vcmp.ne.s32.totalorder %v1199_v13, 0 }
  0x78   :  { %1839 = vmatprep.subr.bf16.mxu1 %v1838_v26  ;;  %1939 = vmatprep.subr.msk.bf16.mxu0 %vm2378_vm11, %v2822_v48 }
  0x7b   :  { %1841 = vmatpush3.bf16.msra.mxu1 %v1838_v26  ;;  %1941 = vmatpush3.bf16.msk.msra.mxu0 %vm2378_vm11, %v2822_v48 }
  0x7c   :  { %1843 = vmatprep.subr.bf16.mxu1 %v1842_v27 }
  0x7e   :  { %1739 = vmatmul.mubr.f32.vlgmr.msra.gmra.mrb[0].mxu0 %v2418_v51 }
  0x7f   :  { %1845 = vmatpush3.bf16.msra.mxu1 %v1842_v27  ;;  %1741 = vmatprep.mubr.f32.mxu0 %v2468_v36 }
  0x82   :  { %1607 = vmatmul.mubr.f32.vlgmr.msra.gmra.mrb[0].mxu1 %v2832_v30  ;;  %1742 = vmatmul.mubr.f32.gmra.mrb[2].mxu0 %v2497_v47 }
  0x83   :  { %1609 = vmatprep.mubr.f32.mxu1 %v2481_v10  ;;  %1744 = vmatprep.mubr.f32.mxu0 %v2520_v9 }
  0x86   :  { %1610 = vmatmul.mubr.f32.gmra.mrb[2].mxu1 %v2513_v5  ;;  %1745 = vmatmul.mubr.f32.gmra.mrb[4].mxu0 %v2552_v6  ;;  %v1196_v5 = vrot.slane %v2685_v7, 1  ;;  %v1198_v6 = vrot.slane %v2685_v7, 3 }
  0x87   :  { %1612 = vmatprep.mubr.f32.mxu1 %v2532_v34  ;;  %1747 = vmatprep.mubr.f32.mxu0 %v2556_v41 }
  0x88   :  { %vm2694_vm5 = vcmp.ne.s32.totalorder %v1196_v5, 0  ;;  %vm2698_vm14 = vcmp.ne.s32.totalorder %v1198_v6, 0 }
  0x8a   :  { %1613 = vmatmul.mubr.f32.gmra.mrb[4].mxu1 %v2559_v21  ;;  %1748 = vmatmul.mubr.f32.gmra.mrb[6].mxu0 %v2579_v43 }
  0x8b   :  { %1615 = vmatprep.mubr.f32.mxu1 %v2566_v31 }
  0x8e   :  { %1616 = vmatmul.mubr.f32.gmra.mrb[6].mxu1 %v2582_v46 }
 0x151   :  { %v1740_v33 = vpop.f32.mrb[0].mxu0 }
 0x152   :  { %v1084_v37 = vpop.f32.mrb[1].mxu0 }
 0x155   :  { %v1608_v54 = vpop.f32.mrb[0].mxu1  ;;  %v1743_v55 = vpop.f32.mrb[2].mxu0 }
 0x156   :  { %v1942_v56 = vadd.f32 %v1740_v33, %v1608_v54  ;;  %v690_v60 = vpop.f32.mrb[1].mxu1  ;;  %v1096_v61 = vpop.f32.mrb[3].mxu0 }
 0x157   :  { %v1943_v0 = vadd.f32 %v1084_v37, %v690_v60 }
 0x158   :  { %v1131_v11 = vmul.f32 %v1942_v56, %v2834_v8 }
 0x159   :  { %v1130_v28 = vmul.f32 %v1943_v0, %v2835_v38  ;;  %v1611_v49 = vpop.f32.mrb[2].mxu1  ;;  %v1746_v51 = vpop.f32.mrb[4].mxu0  ;;  %v2849_v38 = vld [vmem:[#allocation17_spill] sm:$0xff] }
 0x15a   :  { %v1144_v48 = vrot.slane %v1131_v11, 4  ;;  %v1944_v36 = vadd.f32 %v1743_v55, %v1611_v49  ;;  %v704_v10 = vpop.f32.mrb[3].mxu1  ;;  %v1108_v47 = vpop.f32.mrb[5].mxu0 }
 0x15b   :  { %v1138_v9 = vrot.slane %v1130_v28, 4  ;;  %v1945_v34 = vadd.f32 %v1096_v61, %v704_v10 }
 0x15c   :  { %v1145_v21 = vadd.f32 %v1144_v48, %v1131_v11  ;;  %v1133_v22 = vmul.f32 %v1944_v36, %v2475_v32 }
 0x15d   :  { %v1139_v4 = vadd.f32 %v1138_v9, %v1130_v28  ;;  %v1132_v53 = vmul.f32 %v1945_v34, %v2836_v35  ;;  %v1614_v41 = vpop.f32.mrb[4].mxu1  ;;  %v1749_v59 = vpop.f32.mrb[6].mxu0 }
 0x15e   :  { %v1146_v14 = vrot.slane %v1145_v21, 2  ;;  %v1156_v31 = vrot.slane %v1133_v22, 4  ;;  %v1946_v63 = vadd.f32 %v1746_v51, %v1614_v41  ;;  %v718_v57 = vpop.f32.mrb[5].mxu1  ;;  %v1120_v39 = vpop.f32.mrb[7].mxu0 }
 0x15f   :  { %v1140_v58 = vrot.slane %v1139_v4, 2  ;;  %v1150_v32 = vrot.slane %v1132_v53, 4  ;;  %v1947_v24 = vadd.f32 %v1108_v47, %v718_v57  ;;  %v2850_v47 = vld [vmem:[#allocation8_spill] sm:$0xff] }
 0x160   :  { %v1147_v52 = vadd.f32 %v1146_v14, %v1145_v21  ;;  %v1157_v44 = vadd.f32 %v1156_v31, %v1133_v22  ;;  %v1135_v43 = vmul.f32 %v1946_v63, %v2841_v1  ;;  %v1202_v31 = vrot.slane %v2685_v7, 7 }
 0x161   :  { %v1141_v46 = vadd.f32 %v1140_v58, %v1139_v4  ;;  %v1151_v16 = vadd.f32 %v1150_v32, %v1132_v53  ;;  %v1134_v23 = vmul.f32 %v1947_v24, %v2844_v2  ;;  %v1617_v12 = vpop.f32.mrb[6].mxu1  ;;  %v1201_v24 = vrot.slane %v2685_v7, 6 }
 0x162   :  { %v1148_v15 = vrot.slane %v1147_v52, 1  ;;  %v1158_v18 = vrot.slane %v1157_v44, 2  ;;  %v1168_v25 = vrot.slane %v1135_v43, 4  ;;  %v1948_v26 = vadd.f32 %v1749_v59, %v1617_v12  ;;  %v732_v27 = vpop.f32.mrb[7].mxu1 }
 0x163   :  { %v1142_v29 = vrot.slane %v1141_v46, 1  ;;  %v1152_v30 = vrot.slane %v1151_v16, 2  ;;  %v1162_v33 = vrot.slane %v1134_v23, 4  ;;  %v1949_v37 = vadd.f32 %v1120_v39, %v732_v27 }
 0x164   :  { %v1149_v54 = vadd.f32 %v1148_v15, %v1147_v52  ;;  %v1159_v55 = vadd.f32 %v1158_v18, %v1157_v44  ;;  %v1169_v56 = vadd.f32 %v1168_v25, %v1135_v43  ;;  %v1137_v61 = vmul.f32 %v1948_v26, %v2573_v40 }
 0x165   :  { %v1143_v0 = vadd.f32 %v1142_v29, %v1141_v46  ;;  %v1153_v3 = vadd.f32 %v1152_v30, %v1151_v16  ;;  %v1163_v8 = vadd.f32 %v1162_v33, %v1134_v23  ;;  %v1136_v28 = vmul.f32 %v1949_v37, %v2849_v38 }
 0x166   :  { %vm1187_vm11 = vcmp.gt.f32.partialorder %v1149_v54, 0.5  ;;  %v1160_v49 = vrot.slane %v1159_v55, 1  ;;  %v1170_v51 = vrot.slane %v1169_v56, 2  ;;  %v1180_v48 = vrot.slane %v1137_v61, 4 }
 0x167   :  { %vm1212_vm12 = vmand %vm1187_vm11, %vm2694_vm5  ;;  %vm1186_vm13 = vcmp.gt.f32.partialorder %v1143_v0, 0.5  ;;  %v1154_v36 = vrot.slane %v1153_v3, 1  ;;  %v1164_v40 = vrot.slane %v1163_v8, 2  ;;  %v1174_v10 = vrot.slane %v1136_v28, 4 }
 0x168   :  { %v1220_v5 = vsel %vm1212_vm12, %v2850_v47, 4294967295  ;;  %vm1211_vm15 = vmand %vm1186_vm13, %vm1194_vm4  ;;  %v1161_v9 = vadd.f32 %v1160_v49, %v1159_v55  ;;  %v1171_v34 = vadd.f32 %v1170_v51, %v1169_v56  ;;  %v1181_v21 = vadd.f32 %v1180_v48, %v1137_v61  ;;  %v32_v49 = vld [vmem:[#allocation2 + $0x20] sm:$0xff] }
 0x169   :  { %v1227_v22 = vrot.slane %v1220_v5, 7  ;;  %v1219_v6 = vsel %vm1211_vm15, %v2850_v47, 4294967295  ;;  %v1155_v4 = vadd.f32 %v1154_v36, %v1153_v3  ;;  %v1165_v35 = vadd.f32 %v1164_v40, %v1163_v8  ;;  %v30_v36 = vld [vmem:[#allocation2 + $0x18] sm:$0xff] }
 0x16a   :  { %vm1189_vm0 = vcmp.gt.f32.partialorder %v1161_v9, 0.5  ;;  %v1172_v53 = vrot.slane %v1171_v34, 1  ;;  %v1182_v62 = vrot.slane %v1181_v21, 2  ;;  %v1175_v41 = vadd.f32 %v1174_v10, %v1136_v28 }
 0x16b   :  { %v1229_v59 = vsel %vm1228_vm9, %v1227_v22, %v1219_v6  ;;  %vm2729_vm1 = vmand %vm1189_vm0, %vm2698_vm14  ;;  %vm1188_vm2 = vcmp.gt.f32.partialorder %v1155_v4, 0.5  ;;  %v1166_v42 = vrot.slane %v1165_v35, 1  ;;  %vm1234_vm4 = vcmask 1043459  }
 0x16c   :  { %v1222_v63 = vsel %vm2729_vm1, %v2850_v47, 4294967295  ;;  %vm1213_vm3 = vmand %vm1188_vm2, %vm2704_vm6  ;;  %v1173_v57 = vadd.f32 %v1172_v53, %v1171_v34  ;;  %v1183_v39 = vadd.f32 %v1182_v62, %v1181_v21  ;;  %v1176_v17 = vrot.slane %v1175_v41, 2 }
 0x16d   :  { %v1221_v58 = vsel %vm1213_vm3, %v2850_v47, 4294967295  ;;  %v1167_v32 = vadd.f32 %v1166_v42, %v1165_v35  ;;  %v1233_v1 = vrot.slane %v1222_v63, 5  ;;  %vm2747_vm6 = vcmp.ne.s32.totalorder %v1202_v31, 0 }
 0x16e   :  { %v1230_v52 = vrot.slane %v1221_v58, 6  ;;  %vm1191_vm5 = vcmp.gt.f32.partialorder %v1173_v57, 0.5  ;;  %v1184_v44 = vrot.slane %v1183_v39, 1  ;;  %v1177_v19 = vadd.f32 %v1176_v17, %v1175_v41 }
 0x16f   :  { %vm2743_vm9 = vmand %vm1191_vm5, %vm2710_vm7  ;;  %vm1190_vm14 = vcmp.gt.f32.partialorder %v1167_v32, 0.5  ;;  %vm1209_vm7 = vcmp.ne.s32.totalorder %v1201_v24, 0  ;;  %vm1237_vm12 = vcmask 1044484   ;;  %vm1240_vm15 = vcmask 1045509  }
 0x170   :  { %v1224_v7 = vsel %vm2743_vm9, %v2850_v47, 4294967295  ;;  %vm1215_vm11 = vmand %vm1190_vm14, %vm2715_vm8  ;;  %v1185_v46 = vadd.f32 %v1184_v44, %v1183_v39  ;;  %v1178_v16 = vrot.slane %v1177_v19, 1  ;;  %v1232_v20 = vsel %vm1231_vm10, %v1230_v52, %v1229_v59 }
 0x171   :  { %v1223_v2 = vsel %vm1215_vm11, %v2850_v47, 4294967295  ;;  %v1235_v23 = vsel %vm1234_vm4, %v1233_v1, %v1232_v20  ;;  %v1239_v15 = vrot.slane %v1224_v7, 3  ;;  %vm1243_vm10 = vcmask 1046534  }
 0x172   :  { %v1236_v13 = vrot.slane %v1223_v2, 4  ;;  %vm1193_vm13 = vcmp.gt.f32.partialorder %v1185_v46, 0.5  ;;  %v1179_v12 = vadd.f32 %v1178_v16, %v1177_v19  ;;  %vm1246_vm2 = vcmask 1047559  }
 0x173   :  { %vm1218_vm0 = vmand %vm1193_vm13, %vm2747_vm6  ;;  %vm1274_vm5 = vcmp.eq.s32.totalorder %v2850_v47, 2  ;;  %vm1273_vm14 = vcmp.eq.s32.totalorder %v2850_v47, 1  ;;  %vm1272_vm6 = vcmp.eq.s32.totalorder %v2850_v47, 0 }
 0x174   :  { %vm1192_vm1 = vcmp.gt.f32.partialorder %v1179_v12, 0.5  ;;  %v1238_v18 = vsel %vm1237_vm12, %v1236_v13, %v1235_v23  ;;  %v1226_v25 = vsel %vm1218_vm0, %v2850_v47, 4294967295 }
 0x175   :  { %vm1217_vm8 = vmand %vm1192_vm1, %vm1209_vm7  ;;  %v1241_v26 = vsel %vm1240_vm15, %v1239_v15, %v1238_v18  ;;  %v1245_v30 = vrot.slane %v1226_v25, 1 }
 0x176   :  { %v1225_v27 = vsel %vm1217_vm8, %v2850_v47, 4294967295 }
 0x177   :  { %v1242_v29 = vrot.slane %v1225_v27, 2 }
 0x179   :  { %v1244_v33 = vsel %vm1243_vm10, %v1242_v29, %v1241_v26 }
 0x17a   :  { %v1247_v37 = vsel %vm1246_vm2, %v1245_v30, %v1244_v33 }
 0x17b   :  { %v1249_v54 = vshra.s32 %v1247_v37, 16  ;;  %v1248_v56 = vand.u32 65535, %v1247_v37 }
 0x17d   :  { %v1251_v55 = vcvt.s32.f32 %v1249_v54  ;;  %v1250_v61 = vcvt.s32.f32 %v1248_v56 }
 0x17f   :  { %1252 = vmax.xlane.f32.xlu0 %v1251_v55 }
 0x20c   :  { %v1253_v60 = vpop.xlane.xlu0 %1252 }
 0x20d   :  { %vm1254_vm3 = vcmp.eq.f32.partialorder %v1251_v55, %v1253_v60  ;;  %v1259_v3 = vcvt.f32.s32 %v1253_v60 }
 0x20e   :  { %v1255_v0 = vsel %vm1254_vm3, %v1250_v61, -inf }
 0x20f   :  { %1256 = vmax.xlane.f32.xlu0 %v1255_v0  ;;  %v1260_v11 = vshll.u32 %v1259_v3, 16 }
 0x29c   :  { %v1257_v8 = vpop.xlane.xlu0 %1256 }
 0x29d   :  { %v1258_v38 = vcvt.f32.s32 %v1257_v8 }
 0x29f   :  { %v1261_v28 = vadd.s32 %v1260_v11, %v1258_v38 }
 0x2a1   :  { %vm1264_vm4 = vcmp.eq.s32.totalorder %v2850_v47, %v1261_v28  ;;  %vm1262_vm9 = vcmp.ge.s32.totalorder %v1261_v28, 0 }
 0x2a2   :  { %v1265_v51 = vsel %vm1264_vm4, 1.0, %v2824_v50  ;;  %v1263_v34 = vsel %vm1262_vm9, 1.0, %v2824_v50 }
 0x2a3   :  { %v1269_v48 = vmul.f32 %v1265_v51, %v32_v49  ;;  %v1266_v40 = vmul.f32 %v1265_v51, %v30_v36 }
 0x2a5   :  { %1270 = vadd.xlane.f32.xlu1 %v1269_v48 }
 0x2a9   :  { %1267 = vadd.xlane.f32.xlu1 %v1266_v40 }
 0x332   :  { %v1271_v10 = vpop.xlane.xlu1 %1270 }
 0x333   :  { %v1275_v5 = vsel %vm1274_vm5, %v1271_v10, 0.0 }
 0x336   :  { %v1268_v9 = vpop.xlane.xlu1 %1267 }
 0x337   :  { %v1276_v21 = vsel %vm1273_vm14, %v1268_v9, %v1275_v5 }
 0x338   :  { %v1277_v22 = vsel %vm1272_vm6, %v1263_v34, %v1276_v21 }
 0x339   :  { %1278 = vst [vmem:[#allocation5] sm:$0xff] %v1277_v22 }
 0x33a   :  { %2025 = shalt.err (!%p2022_p12)
}
 0x33b   :  { %s2026_s24 = scalar_lea.hbm %s2782_s1, 128 }
 0x33c   :  { %p2027_p13 = scmp.ne.s32.totalorder %s2782_s1, %s2026_s24  ;;  %p2030_p0 = scmp.lt.u32.totalorder %s2026_s24, %s2782_s1 }
 0x33e   :  { %p2032_p1 = pnand %p2030_p0, %p2027_p13 }
 0x340   :  { %2035 = shalt.err (!%p2032_p1)
}
 0x341   :  { %1288 = dma.vmem_to_hbm [thread:$0]  %s1286_s20, 128, %s2782_s1, [#allocation4]  }
 0x342   :  { %2038 = dma.done.wait [#allocation4], 128  }
 0x343   :  { %2039 = vsyncadd [#allocation4], 4294967168 }
 0x344   :  { %1292 = vsyncpa [#allocation3], 1 }
 0x345   :  { %1293 = vsyncpa [#allocation4], 1 }

</bundles_post_ra>
